<compile_context>
chip_gen: v5e
topology: v5e:2x2
jax: 0.10.0
libtpu: 0.0.40
codegen_flags: <defaults>
</compile_context>

<pallas_src>
import functools

import jax
import jax.numpy as jnp
from jax import lax
from jax.experimental import pallas as pl
from jax.experimental.pallas import tpu as pltpu

DROPOUT_P = 0.1
_NEG_BIG = -1e30  # finite "minus infinity" for masked scores (avoids inf-inf corner cases)

# lowbias32-style mixer constants (non-TPU fallback only)
_H1, _H2, _H3 = 0x9E3779B1, 0x85EBCA77, 0xC2B2AE3D
_M1, _M2 = 0x7FEB352D, 0x846CA68B


def _round_up(x, m):
    return ((x + m - 1) // m) * m


def _pick_tile(s, req):
    """Largest sublane-legal tile (multiple of 8) not exceeding the padded seq length."""
    return _round_up(min(req, _round_up(s, 8)), 8)


def _flash_attn_dropout_kernel(seed_ref,                      # SMEM scalar prefetch
                               q_ref, k_ref, v_ref,           # VMEM input tiles
                               o_ref,                         # VMEM output tile
                               qbf_sc, m_sc, l_sc, acc_sc,    # VMEM scratch
                               *, scale, seq_len, mask_kv,
                               keep_thresh_31, keep_thresh_32,
                               inv_keep, on_tpu):
    b = pl.program_id(0)
    qi = pl.program_id(1)
    ki = pl.program_id(2)
    n_kv = pl.num_programs(2)
    tq = q_ref.shape[0]
    tkv = k_ref.shape[0]

    @pl.when(ki == 0)
    def _init():
        m_sc[...] = jnp.full_like(m_sc, _NEG_BIG)
        l_sc[...] = jnp.zeros_like(l_sc)
        acc_sc[...] = jnp.zeros_like(acc_sc)
        # fold 1/inv_scale_factor into the one-time bf16 cast of the resident q tile
        q = q_ref[...]
        if scale != 1.0:
            q = q * jnp.float32(scale)
        qbf_sc[...] = q.astype(jnp.bfloat16)

    # scores: bf16 MXU operands, f32 accumulate; contract last dims (no materialized k.T)
    s = lax.dot_general(qbf_sc[...], k_ref[...].astype(jnp.bfloat16),
                        (((1,), (1,)), ((), ())),
                        preferred_element_type=jnp.float32)          # (tq, tkv) f32

    if mask_kv:  # static flag: only emitted when seq was padded up to a tile multiple
        col = lax.broadcasted_iota(jnp.int32, (tq, tkv), 1) + ki * tkv
        s = jnp.where(col < seq_len, s, jnp.float32(_NEG_BIG))

    # online softmax update
    m_prev = m_sc[...]
    m_new = jnp.maximum(m_prev, jnp.max(s, axis=-1, keepdims=True))
    alpha = jnp.exp(m_prev - m_new)
    e = jnp.exp(s - m_new)                                           # f32, NOT dropout-masked

    # dropout keep mask (keep prob = 1 - p)
    if on_tpu:
        pltpu.prng_seed(seed_ref[0], b, qi, ki)
        bits = pltpu.prng_random_bits((tq, tkv))
        r31 = bits & jnp.array(0x7FFFFFFF, dtype=bits.dtype)         # uniform in [0, 2^31)
        keep = r31 >= keep_thresh_31
    else:
        # portable counter-based hash fallback (interpret / CPU); row/col terms hoisted
        row_h = ((lax.broadcasted_iota(jnp.int32, (tq, 1), 0) + qi * tq)
                 .astype(jnp.uint32) * jnp.uint32(_H1))
        col_h = ((lax.broadcasted_iota(jnp.int32, (1, tkv), 1) + ki * tkv)
                 .astype(jnp.uint32) * jnp.uint32(_H2)
                 + b.astype(jnp.uint32) * jnp.uint32(_H3)
                 + seed_ref[0].astype(jnp.uint32))
        h = row_h + col_h
        h = h ^ (h >> 16)
        h = h * jnp.uint32(_M1)
        h = h ^ (h >> 15)
        h = h * jnp.uint32(_M2)
        h = h ^ (h >> 16)
        keep = h >= jnp.uint32(keep_thresh_32)

    # softmax normalizes over ALL keys -> l uses the un-dropped e; only acc uses dropped e.
    l_sc[...] = alpha * l_sc[...] + jnp.sum(e, axis=-1, keepdims=True)
    p_bf = jnp.where(keep, e, 0.0).astype(jnp.bfloat16)              # PV matmul operand only
    acc_sc[...] = alpha * acc_sc[...] + jnp.dot(
        p_bf, v_ref[...].astype(jnp.bfloat16), preferred_element_type=jnp.float32)
    m_sc[...] = m_new

    @pl.when(ki == n_kv - 1)
    def _finalize():
        l = l_sc[...]
        inv_l = pl.reciprocal(l, approx=True) if on_tpu else 1.0 / l
        # fold the dropout 1/(1-p) rescale into the per-row scalar
        o_ref[...] = (acc_sc[...] * (inv_l * jnp.float32(inv_keep))).astype(o_ref.dtype)


def attention_with_dropout(query, key, value, inv_scale_factor,
                           seed=0, p=DROPOUT_P, tq=256, tkv=512):
    query = jnp.asarray(query, jnp.float32)
    key = jnp.asarray(key, jnp.float32)
    value = jnp.asarray(value, jnp.float32)

    B, S, Dk = query.shape
    Dv = value.shape[-1]

    tq = _pick_tile(S, tq)
    tkv = _pick_tile(S, tkv)
    sq = _round_up(S, tq)       # padded query length
    skv = _round_up(S, tkv)     # padded key/value length
    n_q = sq // tq
    n_kv = skv // tkv

    q_in = query if sq == S else jnp.pad(query, ((0, 0), (0, sq - S), (0, 0)))
    k_in = key if skv == S else jnp.pad(key, ((0, 0), (0, skv - S), (0, 0)))
    v_in = value if skv == S else jnp.pad(value, ((0, 0), (0, skv - S), (0, 0)))

    p = float(p)
    scale = 1.0 / float(inv_scale_factor)
    on_tpu = jax.default_backend() == "tpu"

    kernel = functools.partial(
        _flash_attn_dropout_kernel,
        scale=scale, seq_len=S, mask_kv=(skv != S),
        keep_thresh_31=int(round(p * (1 << 31))),
        keep_thresh_32=int(round(p * (1 << 32))),
        inv_keep=1.0 / (1.0 - p), on_tpu=on_tpu)

    flops = 2 * B * sq * skv * (Dk + Dv)
    # q read once, K and V re-streamed n_q times, output written once
    bytes_accessed = 4 * B * (sq * Dk + n_q * skv * (Dk + Dv) + sq * Dv)

    grid_spec = pltpu.PrefetchScalarGridSpec(
        num_scalar_prefetch=1,                 # seed lives in SMEM -> no recompile per seed
        grid=(B, n_q, n_kv),
        in_specs=[
            pl.BlockSpec((None, tq, Dk), lambda b, qi, ki, seed: (b, qi, 0)),     # query
            pl.BlockSpec((None, tkv, Dk), lambda b, qi, ki, seed: (b, ki, 0)),    # key
            pl.BlockSpec((None, tkv, Dv), lambda b, qi, ki, seed: (b, ki, 0)),    # value
            # TODO(synk): add pipeline_mode=pl.Buffered(3) on K/V if profiling shows exposed DMA.
        ],
        out_specs=pl.BlockSpec((None, tq, Dv), lambda b, qi, ki, seed: (b, qi, 0)),
        scratch_shapes=[
            pltpu.VMEM((tq, Dk), jnp.bfloat16),   # scaled q, bf16, resident per q-tile
            pltpu.VMEM((tq, 1), jnp.float32),     # running max m
            pltpu.VMEM((tq, 1), jnp.float32),     # running denom l
            pltpu.VMEM((tq, Dv), jnp.float32),    # output accumulator
        ])

    out_padded = pl.pallas_call(
        kernel,
        out_shape=jax.ShapeDtypeStruct((B, sq, Dv), jnp.float32),
        grid_spec=grid_spec,
        compiler_params=pltpu.CompilerParams(
            # NOTE: on v7x the two leading axes could use pltpu.CORE_PARALLEL to engage both
            # TensorCores; plain "parallel" kept here as the portable default.
            dimension_semantics=("parallel", "parallel", "arbitrary")),
        cost_estimate=pl.CostEstimate(
            flops=flops,
            transcendentals=B * sq * skv,
            bytes_accessed=bytes_accessed),
    )(jnp.asarray([seed], dtype=jnp.int32), q_in, k_in, v_in)

    return out_padded if sq == S else out_padded[:, :S, :]


def _reference_no_dropout(query, key, value, inv_scale_factor):
    s = jnp.einsum("bqd,bkd->bqk", query, key) / inv_scale_factor
    w = jax.nn.softmax(s, axis=-1)
    return jnp.einsum("bqk,bkd->bqd", w, value)


if __name__ == "__main__":
    # Small shapes consistent with the module's (batch, seq, dim) inputs; S=12 with 8x8 tiles
    # exercises multi-step online softmax, padded-key masking and padded-query-row slicing.
    B, S, Dk, Dv = 2, 12, 16, 8
    k0 = jax.random.PRNGKey(0)
    kq, kk, kv = jax.random.split(k0, 3)
    query = jax.random.normal(kq, (B, S, Dk), dtype=jnp.float32)
    key = jax.random.normal(kk, (B, S, Dk), dtype=jnp.float32)
    value = jax.random.normal(kv, (B, S, Dv), dtype=jnp.float32)
    inv_scale_factor = 1.0

    # Dropout path (matches the module's forward; RNG stream is TPU-PRNG based, so it does
    # not bit-match torch's dropout stream — only the distribution/semantics match).
    out = attention_with_dropout(query, key, value, inv_scale_factor,
                                 seed=0, p=DROPOUT_P, tq=8, tkv=8)
    jax.block_until_ready(out)
    assert out.shape == (B, S, Dv)
    assert out.dtype == jnp.float32
    assert bool(jnp.all(jnp.isfinite(out)))

    # p=0 sanity check against a pure-JAX softmax-attention reference (bf16 MXU tolerance).
    out_nd = attention_with_dropout(query, key, value, inv_scale_factor,
                                    seed=0, p=0.0, tq=8, tkv=8)
    ref = _reference_no_dropout(query, key, value, inv_scale_factor)
    jax.block_until_ready(out_nd)
    assert bool(jnp.allclose(out_nd, ref, rtol=5e-2, atol=5e-2))

    print("KERNEL_OK")
</pallas_src>

<mosaic_0001>
module attributes {stable_mosaic.version = 11 : i64} {
  func.func @_flash_attn_dropout_kernel(%arg0: i32, %arg1: i32, %arg2: i32, %arg3: memref<1xi32, #tpu.memory_space<smem>>, %arg4: memref<1x8x16xf32, #tpu.memory_space<vmem>>, %arg5: memref<1x8x16xf32, #tpu.memory_space<vmem>>, %arg6: memref<1x8x8xf32, #tpu.memory_space<vmem>>, %arg7: memref<1x8x8xf32, #tpu.memory_space<vmem>>, %arg8: memref<8x16xbf16, #tpu.memory_space<vmem>>, %arg9: memref<8x1xf32, #tpu.memory_space<vmem>>, %arg10: memref<8x1xf32, #tpu.memory_space<vmem>>, %arg11: memref<8x8xf32, #tpu.memory_space<vmem>>) attributes {dimension_semantics = [#tpu.dimension_semantics<parallel>, #tpu.dimension_semantics<parallel>, #tpu.dimension_semantics<arbitrary>], iteration_bounds = array<i64: 2, 2, 2>, scalar_prefetch = 1 : i64, scratch_operands = 4 : i64, tpu.core_type = #tpu.core_type<tc>, window_params = [{transform_indices = @transform_0, window_bounds = array<i64: 1, 8, 16>}, {transform_indices = @transform_1, window_bounds = array<i64: 1, 8, 16>}, {transform_indices = @transform_2, window_bounds = array<i64: 1, 8, 8>}, {transform_indices = @transform_3, window_bounds = array<i64: 1, 8, 8>}]} {
    %c0_i32 = arith.constant 0 : i32
    %0 = arith.cmpi eq, %arg2, %c0_i32 : i32
    %1 = arith.extui %0 : i1 to i32
    %c0_i32_0 = arith.constant 0 : i32
    %2 = arith.cmpi ne, %1, %c0_i32_0 : i32
    scf.if %2 {
      %cst_30 = arith.constant -1.000000e+30 : f32
      %83 = vector.broadcast %cst_30 : f32 to vector<8x1xf32>
      %c0_31 = arith.constant 0 : index
      %c0_32 = arith.constant 0 : index
      %84 = vector.load %arg9[%c0_31, %c0_32] : memref<8x1xf32, #tpu.memory_space<vmem>>, vector<8x1xf32>
      tpu.vector_store %arg9[%c0_31, %c0_32], %83 {strides = array<i32>} : memref<8x1xf32, #tpu.memory_space<vmem>>, vector<8x1xf32>,
      %cst_33 = arith.constant 0.000000e+00 : f32
      %85 = vector.broadcast %cst_33 : f32 to vector<8x1xf32>
      %c0_34 = arith.constant 0 : index
      %c0_35 = arith.constant 0 : index
      %86 = vector.load %arg10[%c0_34, %c0_35] : memref<8x1xf32, #tpu.memory_space<vmem>>, vector<8x1xf32>
      tpu.vector_store %arg10[%c0_34, %c0_35], %85 {strides = array<i32>} : memref<8x1xf32, #tpu.memory_space<vmem>>, vector<8x1xf32>,
      %cst_36 = arith.constant 0.000000e+00 : f32
      %87 = vector.broadcast %cst_36 : f32 to vector<8x8xf32>
      %c0_37 = arith.constant 0 : index
      %c0_38 = arith.constant 0 : index
      %88 = vector.load %arg11[%c0_37, %c0_38] : memref<8x8xf32, #tpu.memory_space<vmem>>, vector<8x8xf32>
      tpu.vector_store %arg11[%c0_37, %c0_38], %87 {strides = array<i32>} : memref<8x8xf32, #tpu.memory_space<vmem>>, vector<8x8xf32>,
      %c0_39 = arith.constant 0 : index
      %c0_40 = arith.constant 0 : index
      %c0_41 = arith.constant 0 : index
      %89 = vector.load %arg4[%c0_39, %c0_40, %c0_41] : memref<1x8x16xf32, #tpu.memory_space<vmem>>, vector<1x8x16xf32>
      %90 = vector.shape_cast %89 : vector<1x8x16xf32> to vector<8x16xf32>
      %91 = arith.truncf %90 : vector<8x16xf32> to vector<8x16xbf16>
      %c0_42 = arith.constant 0 : index
      %c0_43 = arith.constant 0 : index
      %92 = vector.load %arg8[%c0_42, %c0_43] : memref<8x16xbf16, #tpu.memory_space<vmem>>, vector<8x16xbf16>
      tpu.vector_store %arg8[%c0_42, %c0_43], %91 {strides = array<i32>} : memref<8x16xbf16, #tpu.memory_space<vmem>>, vector<8x16xbf16>,
    } else {
    }
    %c0 = arith.constant 0 : index
    %c0_1 = arith.constant 0 : index
    %3 = vector.load %arg8[%c0, %c0_1] : memref<8x16xbf16, #tpu.memory_space<vmem>>, vector<8x16xbf16>
    %c0_2 = arith.constant 0 : index
    %c0_3 = arith.constant 0 : index
    %c0_4 = arith.constant 0 : index
    %4 = vector.load %arg5[%c0_2, %c0_3, %c0_4] : memref<1x8x16xf32, #tpu.memory_space<vmem>>, vector<1x8x16xf32>
    %5 = vector.shape_cast %4 : vector<1x8x16xf32> to vector<8x16xf32>
    %6 = arith.truncf %5 : vector<8x16xf32> to vector<8x16xbf16>
    %cst = arith.constant dense<0.000000e+00> : vector<8x8xf32>
    %7 = tpu.matmul %3, %6, %cst {dimension_numbers = #tpu.dot_dimension_numbers<[1], [1], [0], [0], [0, 0, 1, 0], [], []>} : vector<8x16xbf16>, vector<8x16xbf16>, vector<8x8xf32> -> vector<8x8xf32>
    %8 = tpu.iota {dimensions = array<i32: 1>} : vector<8x8xi32>
    %c8_i32 = arith.constant 8 : i32
    %9 = arith.muli %arg2, %c8_i32 : i32
    %10 = vector.broadcast %9 : i32 to vector<8x8xi32>
    %11 = arith.addi %8, %10 : vector<8x8xi32>
    %c12_i32 = arith.constant 12 : i32
    %12 = vector.broadcast %c12_i32 : i32 to vector<8x8xi32>
    %13 = arith.cmpi slt, %11, %12 : vector<8x8xi32>
    %cst_5 = arith.constant -1.000000e+30 : f32
    %14 = vector.broadcast %cst_5 : f32 to vector<8x8xf32>
    %15 = arith.select %13, %7, %14 : vector<8x8xi1>, vector<8x8xf32>
    %c0_6 = arith.constant 0 : index
    %c0_7 = arith.constant 0 : index
    %16 = vector.load %arg9[%c0_6, %c0_7] : memref<8x1xf32, #tpu.memory_space<vmem>>, vector<8x1xf32>
    %cst_8 = arith.constant dense<0xFF800000> : vector<8xf32>
    %17 = vector.multi_reduction <maximumf>, %15, %cst_8 [1] : vector<8x8xf32> to vector<8xf32>
    %18 = vector.shape_cast %17 : vector<8xf32> to vector<8x1xf32>
    %19 = arith.maximumf %16, %18 : vector<8x1xf32>
    %20 = arith.subf %16, %19 : vector<8x1xf32>
    %21 = math.exp %20 : vector<8x1xf32>
    %22 = vector.broadcast %19 : vector<8x1xf32> to vector<8x8xf32>
    %23 = arith.subf %15, %22 : vector<8x8xf32>
    %24 = math.exp %23 : vector<8x8xf32>
    %25 = tpu.iota {dimensions = array<i32: 0>} : vector<8x1xi32>
    %c8_i32_9 = arith.constant 8 : i32
    %26 = arith.muli %arg1, %c8_i32_9 : i32
    %27 = vector.broadcast %26 : i32 to vector<8x1xi32>
    %28 = arith.addi %25, %27 : vector<8x1xi32>
    %c-1640531535_i32 = arith.constant -1640531535 : i32
    %29 = vector.broadcast %c-1640531535_i32 : i32 to vector<8x1xi32>
    %30 = arith.muli %28, %29 : vector<8x1xi32>
    %31 = tpu.iota {dimensions = array<i32: 1>} : vector<1x8xi32>
    %c8_i32_10 = arith.constant 8 : i32
    %32 = arith.muli %arg2, %c8_i32_10 : i32
    %33 = vector.broadcast %32 : i32 to vector<1x8xi32>
    %34 = arith.addi %31, %33 : vector<1x8xi32>
    %c-2048144777_i32 = arith.constant -2048144777 : i32
    %35 = vector.broadcast %c-2048144777_i32 : i32 to vector<1x8xi32>
    %36 = arith.muli %34, %35 : vector<1x8xi32>
    %c-1028477379_i32 = arith.constant -1028477379 : i32
    %37 = arith.muli %arg0, %c-1028477379_i32 : i32
    %38 = vector.broadcast %37 : i32 to vector<1x8xi32>
    %39 = arith.addi %36, %38 : vector<1x8xi32>
    %c0_11 = arith.constant 0 : index
    %40 = memref.load %arg3[%c0_11] : memref<1xi32, #tpu.memory_space<smem>>
    %41 = vector.broadcast %40 : i32 to vector<1x8xi32>
    %42 = arith.addi %39, %41 : vector<1x8xi32>
    %43 = vector.broadcast %30 : vector<8x1xi32> to vector<8x8xi32>
    %44 = vector.broadcast %42 : vector<1x8xi32> to vector<8x8xi32>
    %45 = arith.addi %43, %44 : vector<8x8xi32>
    %c16_i32 = arith.constant 16 : i32
    %46 = vector.broadcast %c16_i32 : i32 to vector<8x8xi32>
    %47 = arith.shrui %45, %46 : vector<8x8xi32>
    %48 = arith.xori %45, %47 : vector<8x8xi32>
    %c2146121005_i32 = arith.constant 2146121005 : i32
    %49 = vector.broadcast %c2146121005_i32 : i32 to vector<8x8xi32>
    %50 = arith.muli %48, %49 : vector<8x8xi32>
    %c15_i32 = arith.constant 15 : i32
    %51 = vector.broadcast %c15_i32 : i32 to vector<8x8xi32>
    %52 = arith.shrui %50, %51 : vector<8x8xi32>
    %53 = arith.xori %50, %52 : vector<8x8xi32>
    %c-2073254261_i32 = arith.constant -2073254261 : i32
    %54 = vector.broadcast %c-2073254261_i32 : i32 to vector<8x8xi32>
    %55 = arith.muli %53, %54 : vector<8x8xi32>
    %c16_i32_12 = arith.constant 16 : i32
    %56 = vector.broadcast %c16_i32_12 : i32 to vector<8x8xi32>
    %57 = arith.shrui %55, %56 : vector<8x8xi32>
    %58 = arith.xori %55, %57 : vector<8x8xi32>
    %c429496730_i32 = arith.constant 429496730 : i32
    %59 = vector.broadcast %c429496730_i32 : i32 to vector<8x8xi32>
    %60 = arith.cmpi uge, %58, %59 : vector<8x8xi32>
    %c0_13 = arith.constant 0 : index
    %c0_14 = arith.constant 0 : index
    %61 = vector.load %arg10[%c0_13, %c0_14] : memref<8x1xf32, #tpu.memory_space<vmem>>, vector<8x1xf32>
    %62 = arith.mulf %21, %61 : vector<8x1xf32>
    %cst_15 = arith.constant dense<0.000000e+00> : vector<8xf32>
    %63 = vector.multi_reduction <add>, %24, %cst_15 [1] : vector<8x8xf32> to vector<8xf32>
    %64 = vector.shape_cast %63 : vector<8xf32> to vector<8x1xf32>
    %65 = arith.addf %62, %64 : vector<8x1xf32>
    %c0_16 = arith.constant 0 : index
    %c0_17 = arith.constant 0 : index
    %66 = vector.load %arg10[%c0_16, %c0_17] : memref<8x1xf32, #tpu.memory_space<vmem>>, vector<8x1xf32>
    tpu.vector_store %arg10[%c0_16, %c0_17], %65 {strides = array<i32>} : memref<8x1xf32, #tpu.memory_space<vmem>>, vector<8x1xf32>,
    %cst_18 = arith.constant 0.000000e+00 : f32
    %67 = vector.broadcast %cst_18 : f32 to vector<8x8xf32>
    %68 = arith.select %60, %24, %67 : vector<8x8xi1>, vector<8x8xf32>
    %69 = arith.truncf %68 : vector<8x8xf32> to vector<8x8xbf16>
    %c0_19 = arith.constant 0 : index
    %c0_20 = arith.constant 0 : index
    %70 = vector.load %arg11[%c0_19, %c0_20] : memref<8x8xf32, #tpu.memory_space<vmem>>, vector<8x8xf32>
    %71 = vector.broadcast %21 : vector<8x1xf32> to vector<8x8xf32>
    %72 = arith.mulf %71, %70 : vector<8x8xf32>
    %c0_21 = arith.constant 0 : index
    %c0_22 = arith.constant 0 : index
    %c0_23 = arith.constant 0 : index
    %73 = vector.load %arg6[%c0_21, %c0_22, %c0_23] : memref<1x8x8xf32, #tpu.memory_space<vmem>>, vector<1x8x8xf32>
    %74 = vector.shape_cast %73 : vector<1x8x8xf32> to vector<8x8xf32>
    %75 = arith.truncf %74 : vector<8x8xf32> to vector<8x8xbf16>
    %cst_24 = arith.constant dense<0.000000e+00> : vector<8x8xf32>
    %76 = tpu.matmul %69, %75, %cst_24 {dimension_numbers = #tpu.dot_dimension_numbers<[1], [0], [0], [1], [0, 0, 1, 1], [], []>} : vector<8x8xbf16>, vector<8x8xbf16>, vector<8x8xf32> -> vector<8x8xf32>
    %77 = arith.addf %72, %76 : vector<8x8xf32>
    %c0_25 = arith.constant 0 : index
    %c0_26 = arith.constant 0 : index
    %78 = vector.load %arg11[%c0_25, %c0_26] : memref<8x8xf32, #tpu.memory_space<vmem>>, vector<8x8xf32>
    tpu.vector_store %arg11[%c0_25, %c0_26], %77 {strides = array<i32>} : memref<8x8xf32, #tpu.memory_space<vmem>>, vector<8x8xf32>,
    %c0_27 = arith.constant 0 : index
    %c0_28 = arith.constant 0 : index
    %79 = vector.load %arg9[%c0_27, %c0_28] : memref<8x1xf32, #tpu.memory_space<vmem>>, vector<8x1xf32>
    tpu.vector_store %arg9[%c0_27, %c0_28], %19 {strides = array<i32>} : memref<8x1xf32, #tpu.memory_space<vmem>>, vector<8x1xf32>,
    %c1_i32 = arith.constant 1 : i32
    %80 = arith.cmpi eq, %arg2, %c1_i32 : i32
    %81 = arith.extui %80 : i1 to i32
    %c0_i32_29 = arith.constant 0 : i32
    %82 = arith.cmpi ne, %81, %c0_i32_29 : i32
    scf.if %82 {
      %c0_30 = arith.constant 0 : index
      %c0_31 = arith.constant 0 : index
      %83 = vector.load %arg10[%c0_30, %c0_31] : memref<8x1xf32, #tpu.memory_space<vmem>>, vector<8x1xf32>
      %cst_32 = arith.constant 1.000000e+00 : f32
      %84 = vector.broadcast %cst_32 : f32 to vector<8x1xf32>
      %85 = arith.divf %84, %83 : vector<8x1xf32>
      %c0_33 = arith.constant 0 : index
      %c0_34 = arith.constant 0 : index
      %86 = vector.load %arg11[%c0_33, %c0_34] : memref<8x8xf32, #tpu.memory_space<vmem>>, vector<8x8xf32>
      %cst_35 = arith.constant 1.11111116 : f32
      %87 = vector.broadcast %cst_35 : f32 to vector<8x1xf32>
      %88 = arith.mulf %85, %87 : vector<8x1xf32>
      %89 = vector.broadcast %88 : vector<8x1xf32> to vector<8x8xf32>
      %90 = arith.mulf %86, %89 : vector<8x8xf32>
      %c0_36 = arith.constant 0 : index
      %c0_37 = arith.constant 0 : index
      %c0_38 = arith.constant 0 : index
      %91 = vector.load %arg7[%c0_36, %c0_37, %c0_38] : memref<1x8x8xf32, #tpu.memory_space<vmem>>, vector<1x8x8xf32>
      %92 = vector.shape_cast %91 : vector<1x8x8xf32> to vector<8x8xf32>
      %93 = vector.shape_cast %90 : vector<8x8xf32> to vector<1x8x8xf32>
      tpu.vector_store %arg7[%c0_36, %c0_37, %c0_38], %93 {strides = array<i32>} : memref<1x8x8xf32, #tpu.memory_space<vmem>>, vector<1x8x8xf32>,
    } else {
    }
    return
  }
  func.func @transform_0(%arg0: i32, %arg1: i32, %arg2: i32, %arg3: memref<1xi32, #tpu.memory_space<smem>>) -> (i32, i32, i32) {
    %c0_i32 = arith.constant 0 : i32
    %c0_i32_0 = arith.constant 0 : i32
    return %arg0, %arg1, %c0_i32 : i32, i32, i32
  }
  func.func @transform_1(%arg0: i32, %arg1: i32, %arg2: i32, %arg3: memref<1xi32, #tpu.memory_space<smem>>) -> (i32, i32, i32) {
    %c0_i32 = arith.constant 0 : i32
    %c0_i32_0 = arith.constant 0 : i32
    return %arg0, %arg2, %c0_i32 : i32, i32, i32
  }
  func.func @transform_2(%arg0: i32, %arg1: i32, %arg2: i32, %arg3: memref<1xi32, #tpu.memory_space<smem>>) -> (i32, i32, i32) {
    %c0_i32 = arith.constant 0 : i32
    %c0_i32_0 = arith.constant 0 : i32
    return %arg0, %arg2, %c0_i32 : i32, i32, i32
  }
  func.func @transform_3(%arg0: i32, %arg1: i32, %arg2: i32, %arg3: memref<1xi32, #tpu.memory_space<smem>>) -> (i32, i32, i32) {
    %c0_i32 = arith.constant 0 : i32
    %c0_i32_0 = arith.constant 0 : i32
    return %arg0, %arg1, %c0_i32 : i32, i32, i32
  }
}

</mosaic_0001>

<bundles_post_ra>
// kernel: tpu_custom_call.1
= control target key start
LH: loop header
LB: loop body
LE: loop exit
PB: predicated region body
PF: predicated region fallthrough
CT: control target
= control target key end

     0   :  { %s1014_s0 = inlined_call_operand.<no memory space> [shape: s32[1], index: 0, kind: input, shape index: {}]   ;;  %s1015_s1 = inlined_call_operand.vmem [shape: f32[2,16,16], index: 1, kind: input, shape index: {}]   ;;  %s1016_s2 = inlined_call_operand.hbm [shape: f32[2,16,16], index: 2, kind: input, shape index: {}]   ;;  %s1017_s3 = inlined_call_operand.vmem [shape: f32[2,16,8], index: 3, kind: input, shape index: {}]   ;;  %s1018_s4 = inlined_call_operand.vmem [shape: f32[2,16,8], index: 4, kind: output, shape index: {}]  }
   0x1   :  { %1021 = sst [smem:[#allocation14_spill]] %s1016_s2 }
   0x2   :  { %9 = sst [smem:[#allocation7]] %s1014_s0 }
   0x3   :  { %10 = vsyncpa [#allocation9], 0 }
   0x4   :  { %12 = vsyncpa [#allocation9 + $0x1], 0  ;;  %s848_s17 = smov 0   ;;  %s850_s18 = smov 0  }
   0x5   :  { %s852_s19 = smov 0   ;;  %s854_s20 = smov 0  }
   0x6   :  { %s856_s21 = smov 0   ;;  %s858_s22 = smov 0  }
   0x7   :  { %s860_s23 = smov 0   ;;  %s862_s24 = smov 0  }
   0x8   :  { %s864_s25 = smov 0   ;;  %s866_s0 = smov 0  }
   0x9 LB: > { %1022 = sst [smem:[#allocation11_spill]] %s806_s24  ;;  %s578_s26 = sadd.s32 4294967295, %s814_s0   ;;  %s814_s0 = sphi %s866_s0, %s18_s0   ;;  %s810_s25 = sphi %s864_s25, %s1039_s25   ;;  %s806_s24 = sphi %s862_s24, %s1032_s24   ;;  %s802_s23 = sphi %s860_s23, %s1038_s23   ;;  %s798_s22 = sphi %s858_s22, %s1037_s22   ;;  %s794_s21 = sphi %s856_s21, %s1030_s21   ;;  %s790_s20 = sphi %s854_s20, %s1036_s20   ;;  %s786_s19 = sphi %s852_s19, %s1035_s19   ;;  %s782_s18 = sphi %s850_s18, %s1034_s18   ;;  %s778_s17 = sphi %s848_s17, %s1033_s17  }
   0xa   : > { %s30_s27 = sadd.s32 1, %s802_s23  ;;  %s33_s28 = sadd.s32 1, %s806_s24 }
   0xb   : > { %p31_p0 = scmp.ge.s32.totalorder %s30_s27, 2  ;;  %s37_s29 = sadd.s32 1, %s810_s25 }
   0xc   : > { %s74_s30 = sadd.s32 1, %s786_s19  ;;  %p81_p1 = scmp.ne.s32.totalorder %s786_s19, %s782_s18 }
   0xd   : > { %s1041_s27 = smov (%p31_p0, %s30_s27), 0  ;;  %s1043_s28 = smov (!%p31_p0, %s33_s28), %s806_s24 }
   0xe   : > { %1023 = sst [smem:[#allocation12_spill]] %s1041_s27  ;;  %s70_s5 = ssub.s32 %s802_s23, %s1041_s27 }
   0xf   : > { %p35_p2 = scmp.ge.s32.totalorder %s1043_s28, 2  ;;  %p82_p3 = scmp.eq.s32.totalorder %s814_s0, 0 }
  0x10   : > { %p87_p4 = scmp.ne.s32.totalorder %s782_s18, %s778_s17  ;;  %p88_p5 = scmp.eq.s32.totalorder %s578_s26, 0 }
  0x11   : > { %s1045_s28 = smov (%p35_p2, %s1043_s28), 0  ;;  %s1047_s29 = smov (!%p35_p2, %s37_s29), %s810_s25 }
  0x12   : > { %1024 = sst [smem:[#allocation13_spill]] %s1045_s28  ;;  %p913_p6 = por %p82_p3, %p81_p1 }
  0x13   : > { %p917_p7 = por %p88_p5, %p87_p4  ;;  %p39_p8 = scmp.ge.s32.totalorder %s1047_s29, 2 }
  0x14   : > { %p608_p9 = scmp.lt.s32.totalorder %s814_s0, 8  ;;  %s178_s8 = sand.u32 1, %s786_s19  }
  0x15   : > { %s1049_s29 = smov (%p39_p8, %s1047_s29), 0  ;;  %s582_s9 = sshll.u32 %s178_s8, 3 }
  0x16   : > { %s69_s10 = ssub.s32 %s810_s25, %s1049_s29  ;;  %s583_s12 = sshll.u32 %s810_s25, 1 }
  0x17   : > { %s71_s11 = sor.u32 %s70_s5, %s69_s10  ;;  %s186_s13 = sadd.s32 %s802_s23, %s583_s12 }
  0x18   : > { %p72_p10 = scmp.eq.s32.totalorder %s71_s11, 0  ;;  %s584_s14 = sshll.u32 %s186_s13, 3 }
  0x19   : > { %s182_s15 = scalar_lea.vmem [#allocation8], %s582_s9  ;;  %s1027_s2 = sld [smem:[#allocation14_spill]] }
  0x1a   : > { %s192_s16 = sshll.u32 %s182_s15, 4  ;;  %p605_p11 = pnand %p608_p9, %p913_p6  ;;  %s193_s16 = int_to_ptr.vmem [resolvable:$true] %s192_s16 }
  0x1b   : > { %s930_s17 = scalar_select %p72_p10, %s786_s19, %s74_s30  }
  0x1c   : > { %p585_p12 = scmp.ge.s32.totalorder %s814_s0, 1  ;;  %p208_p13 = scmp.lt.s32.totalorder %s814_s0, 9 }
  0x1d   : > { %s179_s5 = scalar_lea.sflag [#allocation9], %s178_s8 }
  0x1e   : > { %p209_p0 = pnand %p585_p12, %p208_p13 }
  0x1f   : > { %s188_s27 = scalar_lea.hbm %s1027_s2, %s584_s14  ;;  %s214_s30 = sand.u32 (!%p209_p0), 1, %s782_s18  }
  0x20   : > { %s190_s24 = sshll.u32 %s188_s27, 4  ;;  %212 = sbr.rel (%p209_p0) target bundleno = 716 (0x2cc), region = 32  ;;  %s191_s24 = int_to_ptr.hbm [resolvable:$true] %s190_s24 }
  0x21   : > { %607 = dma.hbm_to_vmem [thread:$0]  (!%p605_p11), %s191_s24, 128, %s193_s16, %s179_s5  }
  0x22   : > { %s942_s9 = sshll.u32 (!%p209_p0), %s214_s30, 3  ;;  %s215_s28 = scalar_lea.sflag (!%p209_p0), [#allocation9], %s214_s30 }
  0x25   : > { %773 = dma.done.wait (%p917_p7), %s215_s28, 128  }
  0x26   : > { %775 = vsyncadd (%p917_p7), %s215_s28, 4294967168  ;;  %p261_p1 = scmp.lt.s32.totalorder %s798_s22, 1  ;;  %p263_p2 = scmp.lt.s32.totalorder %s794_s21, 1 }
  0x27   : > { %p271_p3 = scmp.lt.s32.totalorder %s790_s20, 1  ;;  %p593_p4 = scmp.ne.s32.totalorder %s790_s20, 0 }
  0x28   : > { %s262_s24 = scalar_select %p261_p1, %s798_s22, 1 }
  0x29   : > { %s264_s27 = scalar_select %p263_p2, %s794_s21, 1 }
  0x2a   : > { %s587_s6 = sshll.u32 %s262_s24, 1 }
  0x2b   : > { %s266_s8 = sadd.s32 %s587_s6, %s264_s27 }
  0x2c   : > { %s588_s11 = sshll.u32 %s266_s8, 3 }
  0x2d   : > { %s268_s14 = scalar_lea.vmem %s1015_s1, %s588_s11  ;;  %s960_s16 = scalar_lea.vmem %s1018_s4, %s588_s11 }
  0x2e   : > { %s272_s26 = scalar_select %p271_p3, %s790_s20, 1 }
  0x2f   : > { %289 = sbr.rel (%p593_p4) target bundleno = 57 (0x39), region = 40 }
  0x30   : > { %s274_s5 = sadd.s32 %s587_s6, %s272_s26 }
  0x31   : > { %s590_s30 = sshll.u32 %s274_s5, 3 }
  0x32   : > { %s966_s2 = scalar_lea.vmem %s1017_s3, %s590_s30 }
  0x34   : > { %vm290_vm0 = vcmask 7168   ;;  %vm293_vm1 = vcmask 64512   ;;  %v295_v0 = vld [vmem:[%s268_s14] sm:$0xff]  ;;  %v816_v1 = vmov -1e+30   ;;  %vm297_vm2 = vcmask 125952  }
  0x35   : > { %291 = vst.msk [vmem:[#allocation3] sm:$0xff] %vm290_vm0, %v816_v1  ;;  %v296_v2 = vpack.c.bf16 %v295_v0, %v295_v0  ;;  %v817_v3 = vmov 0.0  }
  0x36   : > { %292 = vst.msk [vmem:[#allocation4] sm:$0xff] %vm290_vm0, %v817_v3 }
  0x37   : > { %294 = vst.msk [vmem:[#allocation5] sm:$0xff] %vm293_vm1, %v817_v3 }
  0x38   : > { %298 = vst.msk [vmem:[#allocation2] sm:$0xf] %vm297_vm2, %v296_v2 }
  0x39 PF: > { %s1028_s24 = scalar_lea.vmem [#allocation8], %s942_s9  ;;  %vm302_vm3 = vcmask 130048   ;;  %v322_v8 = vlaneseq  ;;  %s595_s10 = sshll.u32 %s790_s20, 3  ;;  %vm330_vm5 = vcmask 64512   ;;  %v818_v26 = vmov 0   ;;  %v388_v34 = vld [vmem:[%s966_s2] sm:$0xff] }
  0x3a   : > { %v300_v4 = vld [vmem:[%s1028_s24] sm:$0xff]  ;;  %s356_s27 = sld [smem:[#allocation7]]  ;;  %v325_v10 = vstv %s595_s10  ;;  %s353_s6 = smul.u32 3266489917, %s798_s22  ;;  %693 = vset.pattern.permute.xlu0 %v818_v26  ;;  %694 = vset.pattern.permute.xlu1 %v818_v26  ;;  %vm377_vm6 = vcmask 7168   ;;  %v389_v35 = vpack.c.bf16 %v388_v34, %v388_v34  ;;  %vm393_vm7 = vcmask 1043456  }
  0x3b   : > { %v301_v5 = vpack.c.bf16 %v300_v4, %v300_v4  ;;  %v323_v9 = vand.u32 127, %v322_v8  ;;  %s596_s8 = sshll.u32 %s794_s21, 3  ;;  %v347_v12 = vshrl.u32 %v322_v8, 7  ;;  %p599_p5 = scmp.ne.s32.totalorder %s790_s20, 1 }
  0x3c   : > { %v349_v13 = vstv %s596_s8  ;;  %v354_v15 = vstv %s353_s6  ;;  %v329_v27 = vld [vmem:[#allocation3] sm:$0xff]  ;;  %v395_v37 = vsel %vm393_vm7, %v389_v35, 0 }
  0x3d   : > { %v307_v6 = vsel %vm302_vm3, %v301_v5, 0  ;;  %v326_v11 = vadd.s32 %v325_v10, %v323_v9  ;;  %v350_v17 = vadd.s32 %v349_v13, %v347_v12  ;;  %404 = vmatpush.bf16.msra.mxu1 %v395_v37  ;;  %v371_v53 = vld [vmem:[#allocation4] sm:$0xff] }
  0x3e   : > { %316 = vmatpush.bf16.xpose.msra.mxu0 %v307_v6  ;;  %v381_v57 = vld [vmem:[#allocation5] sm:$0xff] }
  0x3f   : > { %v299_v7 = vld [vmem:[#allocation2] sm:$0xf]  ;;  %v352_v14 = vmul.u32 2246822519, %v326_v11  ;;  %v351_v19 = vmul.u32 2654435761, %v350_v17 }
  0x40   : > { %v357_v16 = vstv %s356_s27  ;;  %vm327_vm4 = vcmp.lt.s32.totalorder %v326_v11, 12 }
  0x41   : > { %v355_v18 = vadd.s32 %v354_v15, %v352_v14 }
  0x43   : > { %v358_v20 = vadd.s32 %v357_v16, %v355_v18 }
  0x45   : > { %594 = vmatmul.msk.bf16.vlgmr.msra.gmra.mxu0 %vm302_vm3, %v299_v7  ;;  %v359_v21 = vadd.s32 %v358_v20, %v351_v19 }
  0x47   : > { %v360_v33 = vshrl.u32 %v359_v21, 16 }
  0x49   : > { %v361_v36 = vxor.u32 %v360_v33, %v359_v21 }
  0x4b   : > { %v362_v38 = vmul.u32 2146121005, %v361_v36 }
  0x4d   : > { %v363_v39 = vshrl.u32 %v362_v38, 15 }
  0x4f   : > { %v364_v40 = vxor.u32 %v363_v39, %v362_v38 }
  0x51   : > { %v365_v41 = vmul.u32 2221713035, %v364_v40 }
  0x53   : > { %v366_v42 = vshrl.u32 %v365_v41, 16 }
  0x55   : > { %v367_v45 = vxor.u32 %v366_v42, %v365_v41 }
  0x57   : > { %v597_v47 = vxor.u32 2147483648, %v367_v45 }
  0x59   : > { %vm370_vm8 = vcmp.ge.s32.totalorder %v597_v47, 2576980378 }
  0xc2   : > { %v318_v22 = vpop.f32.mrf.mxu0 }
  0xc3   : > { %v328_v23 = vsel %vm327_vm4, %v318_v22, -1e+30 }
  0xc4   : > { %v331_v24 = vsel %vm330_vm5, %v328_v23, -inf }
  0xc5   : > { %332 = vmax.xlane.f32.xlu0 %v331_v24 }
  0xca   : > { %v320_v25 = vpop.f32.mrf.mxu0 }
 0x138   : > { %v333_v28 = vpop.xlane.xlu0 %332 }
 0x139   : > { %v334_v29 = vmax.f32 %v329_v27, %v333_v28 }
 0x13b   : > { %v335_v30 = vsub.f32 %v329_v27, %v334_v29  ;;  %412 = vst.msk [vmem:[#allocation3] sm:$0xff] %vm377_vm6, %v334_v29  ;;  %340 = vperm.xlu0 %693, %v334_v29  }
 0x13d   : > { %v336_v31 = vmul.f32 1.442695, %v335_v30 }
 0x13f   : > { %695 = vpow2.f32 %v336_v31 }
 0x145   : > { %v696_v32 = vpop.eup %695 }
 0x146   : > { %384 = vperm.xlu1 %694, %v696_v32   ;;  %v372_v54 = vmul.f32 %v696_v32, %v371_v53 }
 0x1ad   : > { %v341_v43 = vpop.permute.xlu0 %340 }
 0x1ae   : > { %v343_v44 = vsub.f32 %v328_v23, %v341_v43 }
 0x1b0   : > { %v344_v46 = vmul.f32 1.442695, %v343_v44 }
 0x1b2   : > { %697 = vpow2.f32 %v344_v46 }
 0x1b8   : > { %v698_v48 = vpop.eup %697  ;;  %v385_v52 = vpop.permute.xlu1 %384 }
 0x1b9   : > { %v373_v49 = vsel %vm330_vm5, %v698_v48, 0.0  ;;  %v379_v50 = vsel %vm370_vm8, %v698_v48, 0.0  ;;  %v387_v58 = vmul.f32 %v385_v52, %v381_v57 }
 0x1ba   : > { %374 = vadd.xlane.f32.xlu1 %v373_v49  ;;  %v380_v51 = vpack.c.bf16 %v379_v50, %v379_v50 }
 0x1bc   : > { %598 = vmatmul.msk.bf16.vlgmr.msra.gmra.mxu1 %vm330_vm5, %v380_v51 }
 0x22d   : > { %v375_v55 = vpop.xlane.xlu1 %374 }
 0x22e   : > { %v376_v56 = vadd.f32 %v375_v55, %v372_v54 }
 0x230   : > { %378 = vst.msk [vmem:[#allocation4] sm:$0xff] %vm377_vm6, %v376_v56 }
 0x239   : > { %v406_v59 = vpop.f32.mrf.mxu1 }
 0x23a   : > { %v410_v60 = vadd.f32 %v406_v59, %v387_v58 }
 0x23c   : > { %411 = vst.msk [vmem:[#allocation5] sm:$0xff] %vm330_vm5, %v410_v60 }
 0x23d   : > { %416 = sbr.rel (%p599_p5) target bundleno = 716 (0x2cc), region = 44 }
 0x241   : > { %v408_v61 = vpop.f32.mrf.mxu1 }
 0x242   : > { %v417_v62 = vld [vmem:[#allocation4] sm:$0xff]  ;;  %v819_v63 = vmov 0  }
 0x243   : > { %699 = vset.pattern.permute.xlu0 %v819_v63  ;;  %700 = vrcp.f32 %v417_v62  ;;  %v429_v2 = vand.u32 2147483648, %v417_v62  ;;  %vm423_vm9 = vweird.f32 %v417_v62  ;;  %v427_v4 = vand.u32 2147483647, %v417_v62  ;;  %v433_v11 = vld [vmem:[#allocation5] sm:$0xff] }
 0x245   : > { %v430_v6 = vor.u32 1.1754944e-38, %v429_v2  ;;  %vm428_vm12 = vcmp.eq.f32.partialorder %v427_v4, 8.507059e+37 }
 0x249   : > { %v701_v0 = vpop.eup %700 }
 0x24a   : > { %v419_v1 = vmul.f32 %v701_v0, %v417_v62  ;;  %vm424_vm10 = vweird.f32 %v701_v0 }
 0x24b   : > { %vm425_vm11 = vmor %vm423_vm9, %vm424_vm10 }
 0x24c   : > { %v420_v3 = vsub.f32 1.0, %v419_v1 }
 0x24e   : > { %v421_v5 = vmul.f32 %v701_v0, %v420_v3 }
 0x250   : > { %v422_v7 = vadd.f32 %v701_v0, %v421_v5 }
 0x252   : > { %v426_v8 = vsel %vm425_vm11, %v701_v0, %v422_v7 }
 0x253   : > { %v431_v9 = vsel %vm428_vm12, %v430_v6, %v426_v8 }
 0x254   : > { %v434_v10 = vmul.f32 1.1111112, %v431_v9 }
 0x256   : > { %437 = vperm.xlu0 %699, %v434_v10  }
 0x2c8   : > { %v438_v12 = vpop.permute.xlu0 %437 }
 0x2c9   : > { %v440_v13 = vmul.f32 %v438_v12, %v433_v11 }
 0x2cb   : > { %441 = vst.msk [vmem:[%s960_s16] sm:$0xff] %vm330_vm5, %v440_v13 }
 0x2cc PF: > { %s18_s0 = sadd.s32 1, %s814_s0   ;;  %s1029_s2 = smov %s930_s17 }
 0x2cd   : > { %p15_p6 = scmp.ge.s32.totalorder %s18_s0, 10   ;;  %s1030_s21 = sld [smem:[#allocation11_spill]] }
 0x2ce   : > { %s1031_s9 = sld [smem:[#allocation12_spill]]  ;;  %s1033_s17 = smov %s782_s18 }
 0x2cf   : > { %s1032_s24 = sld [smem:[#allocation13_spill]]  ;;  %s1034_s18 = smov %s786_s19 }
 0x2d0   : > { %s1035_s19 = smov %s1029_s2  ;;  %s1036_s20 = smov %s802_s23 }
 0x2d1   : > { %s1037_s22 = smov %s810_s25  ;;  %s1039_s25 = smov %s1049_s29 }
 0x2d2   :  { %17 = sbr.rel (!%p15_p6) target bundleno = 9 (0x9), region = 86 }
 0x2d4   : > { %s1038_s23 = smov %s1031_s9 }
 0x2d7   :  { %469 = vsyncpa [#allocation9], 1 }
 0x2d8   :  { %471 = vsyncpa [#allocation9 + $0x1], 1 }

</bundles_post_ra>
